<compile_context>
chip_gen: v7x
topology: tpu7x:2x2x1
jax: 0.10.0
libtpu: 0.0.40
codegen_flags: <defaults>
</compile_context>

<pallas_src>
import functools

import jax
import jax.numpy as jnp
from jax import lax
from jax.experimental import pallas as pl
from jax.experimental.pallas import tpu as pltpu


def time_attention_kernel(x_ref, wf_ref, ba1_ref, wa2_ref, ba2_ref,
                          wo_ref, embp_ref, bo_ref, yf_ref, aw_ref):
    """One batch tile, computed in (feature, batch) orientation.

    Shapes (TB = batch tile on the lane axis):
      x_ref    (TB, D)  -- native row-major x block (no HBM transpose)
      wf_ref   (2H, D)  ba1_ref (H, 1)   wa2_ref (T, H)   ba2_ref (T, 1)
      wo_ref   (1, H)   embp_ref (H, T)  bo_ref (1, 1) [SMEM]
      yf_ref / aw_ref (T, TB)
    """
    H = ba1_ref.shape[0]
    T = embp_ref.shape[1]

    # One fused MXU pass for both x-projections (feature mixer + attention L1).
    # Contraction is over the LAST dim of both operands (A @ B^T form), so the
    # (TB, D) block is consumed as-is; Mosaic handles the transposed RHS feed.
    proj = lax.dot_general(
        wf_ref[...], x_ref[...],
        dimension_numbers=(((1,), (1,)), ((), ())),
        preferred_element_type=jnp.float32)                           # (2H, TB)
    xm_t = proj[:H, :]                                                # (H, TB)
    h1_t = jnp.tanh(proj[H:, :] + ba1_ref[...])                       # (H, TB)

    # Attention scores + numerically stable softmax over T (sublane axis).
    scores = jnp.dot(wa2_ref[...], h1_t.astype(wa2_ref.dtype),
                     preferred_element_type=jnp.float32) + ba2_ref[...]   # (T, TB)
    m = jnp.max(scores, axis=0, keepdims=True)
    e = jnp.exp(scores - m)
    den = jnp.sum(e, axis=0, keepdims=True)
    # Exact reciprocal to keep 1e-5 parity with the f32 reference; approx=True
    # would route the divide to the otherwise-idle EUP slot.
    attn = e * pl.reciprocal(den)                                     # (T, TB)

    # Output layer: static unroll over the tiny T so no (H, T, TB) slab is ever
    # materialized; the H-contraction rides the otherwise-idle MXU (M=1, K=H).
    bo = bo_ref[0, 0]
    wo = wo_ref[...]                                                  # (1, H)
    embp = embp_ref[...]                                              # (H, T)
    rows = []
    for t in range(T):                                                # static unroll
        feat_t = jnp.maximum(xm_t + embp[:, t:t + 1], 0.0)            # relu, (H, TB)
        rows.append(jnp.dot(wo, feat_t,
                            preferred_element_type=jnp.float32) + bo)     # (1, TB)
    y_un = jnp.concatenate(rows, axis=0)                              # (T, TB)

    yf_ref[...] = (y_un * attn).astype(yf_ref.dtype)
    aw_ref[...] = attn.astype(aw_ref.dtype)


def _round_up(n, m):
    return ((n + m - 1) // m) * m


@functools.partial(jax.jit,
                   static_argnames=("max_block_b", "use_bf16", "transpose_outputs"))
def time_attention_forward(x, params, max_block_b=8192, use_bf16=False,
                           transpose_outputs=True):
    B, D = x.shape
    H = params["wmx"].shape[1]
    T = params["emb"].shape[0]

    # --- batch-invariant precompute, hoisted out of the kernel -------------
    embp_t = (params["emb"] @ params["wmt"] + params["bm"]).T          # (H, T)
    wf_t = jnp.concatenate([params["wmx"], params["wa1"]], axis=1).T   # (2H, D)
    ba1_t = params["ba1"].T                                            # (H, 1)
    wa2_t = params["wa2"].T                                            # (T, H)
    ba2_t = params["ba2"].T                                            # (T, 1)
    wo = params["wo"]                                                  # (1, H)
    bo = params["bo"]                                                  # (1, 1) -> SMEM

    # --- batch tiling on the lane axis --------------------------------------
    # >= 2 grid steps when possible (v7x megacore sharding of the "parallel"
    # axis), tile a multiple of 128 (unmasked stores / aligned DMA), capped by
    # max_block_b to stay inside VMEM (v5e: keep <= ~4-8K; v6e: up to 16-32K ok).
    cap = _round_up(max(max_block_b, 128), 128)
    n_steps = max(2, pl.cdiv(B, cap))
    TB = max(128, min(cap, _round_up(pl.cdiv(B, n_steps), 128)))
    B_pad = _round_up(B, TB)
    grid = (B_pad // TB,)

    x_in = x if B_pad == B else jnp.pad(x, ((0, B_pad - B), (0, 0)))
    if use_bf16:
        # bf16 MXU operands (v6e/v7x): halves x HBM traffic; accumulation and all
        # nonlinear math stay f32.  Expect ~1e-2 relative error vs f32.
        x_in = x_in.astype(jnp.bfloat16)
        wf_t = wf_t.astype(jnp.bfloat16)
        wa2_t = wa2_t.astype(jnp.bfloat16)

    const = lambda i: (0, 0)
    yf_t, aw_t = pl.pallas_call(
        time_attention_kernel,
        out_shape=(jax.ShapeDtypeStruct((T, B_pad), jnp.float32),
                   jax.ShapeDtypeStruct((T, B_pad), jnp.float32)),
        grid=grid,
        in_specs=[
            pl.BlockSpec((TB, D), lambda i: (i, 0)),        # x, native layout, tiled
            pl.BlockSpec((2 * H, D), const),                # fused weight (resident)
            pl.BlockSpec((H, 1), const),                    # ba1
            pl.BlockSpec((T, H), const),                    # wa2
            pl.BlockSpec((T, 1), const),                    # ba2
            pl.BlockSpec((1, H), const),                    # wo
            pl.BlockSpec((H, T), const),                    # emb_proj (+ bm)
            pl.BlockSpec(memory_space=pltpu.MemorySpace.SMEM),  # bo scalar
        ],
        out_specs=(pl.BlockSpec((T, TB), lambda i: (0, i)),
                   pl.BlockSpec((T, TB), lambda i: (0, i))),
        compiler_params=pltpu.CompilerParams(
            dimension_semantics=("parallel",),
            vmem_limit_bytes=40 * 1024 * 1024),
    )(x_in, wf_t, ba1_t, wa2_t, ba2_t, wo, embp_t, bo)

    if not transpose_outputs:
        # Lane-dense (T, B) slabs for consumers that can take them (cheapest path).
        return yf_t[:, :B], aw_t[:, :B]
    # PyTorch (B, T) orientation: slice first so the transpose touches only B*T.
    return yf_t[:, :B].T, aw_t[:, :B].T


def reference_forward(x, params):
    """Pure-JAX mirror of the PyTorch forward (explicit concat), for verification."""
    B = x.shape[0]
    T, E = params["emb"].shape
    time_embed = jnp.broadcast_to(params["emb"][None], (B, T, E))        # (B, T, E)
    x_expanded = jnp.broadcast_to(x[:, None, :], (B, T, x.shape[1]))     # (B, T, D)
    x_time = jnp.concatenate([x_expanded, time_embed], axis=-1)          # (B, T, D+E)
    wm = jnp.concatenate([params["wmx"], params["wmt"]], axis=0)         # (D+E, H)
    features = jax.nn.relu(x_time @ wm + params["bm"][0])                # (B, T, H)
    y_un = (features @ params["wo"][0][:, None])[..., 0] + params["bo"][0, 0]
    h1 = jnp.tanh(x @ params["wa1"] + params["ba1"][0])
    scores = h1 @ params["wa2"] + params["ba2"][0]
    attn = jax.nn.softmax(scores, axis=1)
    return y_un * attn, attn


def init_params(key, input_dim, time_steps, hidden_dim=32, embed_dim=16):
    ks = jax.random.split(key, 8)
    s = lambda n: 1.0 / jnp.sqrt(jnp.float32(n))
    return {
        # nn.Embedding(time_steps, 16)
        "emb": jax.random.normal(ks[0], (time_steps, embed_dim), jnp.float32),
        # nn.Linear(input_dim + 16, hidden_dim), weight split along input dim
        "wmx": jax.random.uniform(ks[1], (input_dim, hidden_dim), jnp.float32,
                                  -s(input_dim + embed_dim), s(input_dim + embed_dim)),
        "wmt": jax.random.uniform(ks[2], (embed_dim, hidden_dim), jnp.float32,
                                  -s(input_dim + embed_dim), s(input_dim + embed_dim)),
        "bm": jax.random.uniform(ks[3], (1, hidden_dim), jnp.float32,
                                 -s(input_dim + embed_dim), s(input_dim + embed_dim)),
        # nn.Linear(hidden_dim, 1)
        "wo": jax.random.uniform(ks[4], (1, hidden_dim), jnp.float32,
                                 -s(hidden_dim), s(hidden_dim)),
        "bo": jnp.full((1, 1), 0.01, jnp.float32),
        # attention: nn.Linear(input_dim, hidden_dim), nn.Linear(hidden_dim, time_steps)
        "wa1": jax.random.uniform(ks[5], (input_dim, hidden_dim), jnp.float32,
                                  -s(input_dim), s(input_dim)),
        "ba1": jax.random.uniform(ks[6], (1, hidden_dim), jnp.float32,
                                  -s(input_dim), s(input_dim)),
        "wa2": jax.random.uniform(ks[7], (hidden_dim, time_steps), jnp.float32,
                                  -s(hidden_dim), s(hidden_dim)),
        "ba2": jnp.full((1, time_steps), 0.02, jnp.float32),
    }


if __name__ == "__main__":
    D, T, H = 8, 5, 32   # input_dim, time_steps (T_timepoints=5), hidden_dim

    key = jax.random.PRNGKey(0)
    k_p, k_x1, k_x2, k_x3 = jax.random.split(key, 4)
    params = init_params(k_p, input_dim=D, time_steps=T, hidden_dim=H)

    # f32 path (exact 1e-5 parity with the f32 reference).
    # B=4: pads to one 128-wide tile.  B=300: pads to 512, TB=256 -> 2 parallel steps.
    for B, k_x in ((4, k_x1), (300, k_x2)):
        x = jax.random.normal(k_x, (B, D), jnp.float32)
        y_final, attn_weights = time_attention_forward(x, params)
        jax.block_until_ready((y_final, attn_weights))

        y_ref, attn_ref = reference_forward(x, params)
        assert y_final.shape == (B, T) and attn_weights.shape == (B, T)
        assert jnp.allclose(y_final, y_ref, atol=1e-5, rtol=1e-5)
        assert jnp.allclose(attn_weights, attn_ref, atol=1e-5, rtol=1e-5)

    # Optional bf16 MXU-operand path (v6e/v7x throughput knob): looser tolerance.
    x = jax.random.normal(k_x3, (256, D), jnp.float32)
    y_bf, a_bf = time_attention_forward(x, params, use_bf16=True)
    jax.block_until_ready((y_bf, a_bf))
    y_ref, a_ref = reference_forward(x, params)
    assert y_bf.shape == (256, T) and a_bf.shape == (256, T)
    assert jnp.allclose(y_bf, y_ref, atol=5e-2, rtol=1e-1)
    assert jnp.allclose(a_bf, a_ref, atol=5e-2, rtol=1e-1)

    print("KERNEL_OK")
</pallas_src>

<mosaic_0001>
module attributes {stable_mosaic.version = 11 : i64} {
  func.func @time_attention_kernel(%arg0: i32, %arg1: memref<128x8xf32, #tpu.memory_space<vmem>>, %arg2: memref<64x8xf32, #tpu.memory_space<vmem>>, %arg3: memref<32x1xf32, #tpu.memory_space<vmem>>, %arg4: memref<5x32xf32, #tpu.memory_space<vmem>>, %arg5: memref<5x1xf32, #tpu.memory_space<vmem>>, %arg6: memref<1x32xf32, #tpu.memory_space<vmem>>, %arg7: memref<32x5xf32, #tpu.memory_space<vmem>>, %arg8: memref<1x1xf32, #tpu.memory_space<smem>>, %arg9: memref<5x128xf32, #tpu.memory_space<vmem>>, %arg10: memref<5x128xf32, #tpu.memory_space<vmem>>) attributes {dimension_semantics = [#tpu.dimension_semantics<parallel>], iteration_bounds = array<i64: 1>, scalar_prefetch = 0 : i64, scratch_operands = 0 : i64, tpu.core_type = #tpu.core_type<tc>, window_params = [{transform_indices = @transform_0, window_bounds = array<i64: 128, 8>}, {pipeline_mode = #tpu.pipeline_mode<synchronous>, transform_indices = @transform_1, window_bounds = array<i64: 64, 8>}, {pipeline_mode = #tpu.pipeline_mode<synchronous>, transform_indices = @transform_2, window_bounds = array<i64: 32, 1>}, {pipeline_mode = #tpu.pipeline_mode<synchronous>, transform_indices = @transform_3, window_bounds = array<i64: 5, 32>}, {pipeline_mode = #tpu.pipeline_mode<synchronous>, transform_indices = @transform_4, window_bounds = array<i64: 5, 1>}, {pipeline_mode = #tpu.pipeline_mode<synchronous>, transform_indices = @transform_5, window_bounds = array<i64: 1, 32>}, {pipeline_mode = #tpu.pipeline_mode<synchronous>, transform_indices = @transform_6, window_bounds = array<i64: 32, 5>}, {transform_indices = @transform_7, window_bounds = array<i64: 1, 1>}, {transform_indices = @transform_8, window_bounds = array<i64: 5, 128>}, {transform_indices = @transform_9, window_bounds = array<i64: 5, 128>}]} {
    %c0 = arith.constant 0 : index
    %c0_0 = arith.constant 0 : index
    %0 = vector.load %arg2[%c0, %c0_0] : memref<64x8xf32, #tpu.memory_space<vmem>>, vector<64x8xf32>
    %c0_1 = arith.constant 0 : index
    %c0_2 = arith.constant 0 : index
    %1 = vector.load %arg1[%c0_1, %c0_2] : memref<128x8xf32, #tpu.memory_space<vmem>>, vector<128x8xf32>
    %cst = arith.constant dense<0.000000e+00> : vector<64x128xf32>
    %2 = tpu.matmul %0, %1, %cst {dimension_numbers = #tpu.dot_dimension_numbers<[1], [1], [0], [0], [0, 0, 1, 0], [], []>} : vector<64x8xf32>, vector<128x8xf32>, vector<64x128xf32> -> vector<64x128xf32>
    %3 = vector.extract_strided_slice %2 {offsets = [0, 0], sizes = [32, 128], strides = [1, 1]} : vector<64x128xf32> to vector<32x128xf32>
    %4 = vector.extract_strided_slice %2 {offsets = [32, 0], sizes = [32, 128], strides = [1, 1]} : vector<64x128xf32> to vector<32x128xf32>
    %c0_3 = arith.constant 0 : index
    %c0_4 = arith.constant 0 : index
    %5 = vector.load %arg3[%c0_3, %c0_4] : memref<32x1xf32, #tpu.memory_space<vmem>>, vector<32x1xf32>
    %6 = vector.broadcast %5 : vector<32x1xf32> to vector<32x128xf32>
    %7 = arith.addf %4, %6 : vector<32x128xf32>
    %8 = math.tanh %7 : vector<32x128xf32>
    %c0_5 = arith.constant 0 : index
    %c0_6 = arith.constant 0 : index
    %9 = vector.load %arg4[%c0_5, %c0_6] : memref<5x32xf32, #tpu.memory_space<vmem>>, vector<5x32xf32>
    %cst_7 = arith.constant dense<0.000000e+00> : vector<5x128xf32>
    %10 = tpu.matmul %9, %8, %cst_7 {dimension_numbers = #tpu.dot_dimension_numbers<[1], [0], [0], [1], [0, 0, 1, 1], [], []>} : vector<5x32xf32>, vector<32x128xf32>, vector<5x128xf32> -> vector<5x128xf32>
    %c0_8 = arith.constant 0 : index
    %c0_9 = arith.constant 0 : index
    %11 = vector.load %arg5[%c0_8, %c0_9] : memref<5x1xf32, #tpu.memory_space<vmem>>, vector<5x1xf32>
    %12 = vector.broadcast %11 : vector<5x1xf32> to vector<5x128xf32>
    %13 = arith.addf %10, %12 : vector<5x128xf32>
    %cst_10 = arith.constant dense<0xFF800000> : vector<128xf32>
    %14 = vector.multi_reduction <maximumf>, %13, %cst_10 [0] : vector<5x128xf32> to vector<128xf32>
    %15 = vector.shape_cast %14 : vector<128xf32> to vector<1x128xf32>
    %16 = vector.broadcast %15 : vector<1x128xf32> to vector<5x128xf32>
    %17 = arith.subf %13, %16 : vector<5x128xf32>
    %18 = math.exp %17 : vector<5x128xf32>
    %cst_11 = arith.constant dense<0.000000e+00> : vector<128xf32>
    %19 = vector.multi_reduction <add>, %18, %cst_11 [0] : vector<5x128xf32> to vector<128xf32>
    %20 = vector.shape_cast %19 : vector<128xf32> to vector<1x128xf32>
    %21 = tpu.reciprocal %20 : vector<1x128xf32> -> vector<1x128xf32>
    %22 = vector.broadcast %21 : vector<1x128xf32> to vector<5x128xf32>
    %23 = arith.mulf %18, %22 : vector<5x128xf32>
    %c0_12 = arith.constant 0 : index
    %c0_13 = arith.constant 0 : index
    %24 = memref.load %arg8[%c0_12, %c0_13] : memref<1x1xf32, #tpu.memory_space<smem>>
    %c0_14 = arith.constant 0 : index
    %c0_15 = arith.constant 0 : index
    %25 = vector.load %arg6[%c0_14, %c0_15] : memref<1x32xf32, #tpu.memory_space<vmem>>, vector<1x32xf32>
    %c0_16 = arith.constant 0 : index
    %c0_17 = arith.constant 0 : index
    %26 = vector.load %arg7[%c0_16, %c0_17] : memref<32x5xf32, #tpu.memory_space<vmem>>, vector<32x5xf32>
    %27 = vector.extract_strided_slice %26 {offsets = [0, 0], sizes = [32, 1], strides = [1, 1]} : vector<32x5xf32> to vector<32x1xf32>
    %28 = vector.broadcast %27 : vector<32x1xf32> to vector<32x128xf32>
    %29 = arith.addf %3, %28 : vector<32x128xf32>
    %cst_18 = arith.constant 0.000000e+00 : f32
    %30 = vector.broadcast %cst_18 : f32 to vector<32x128xf32>
    %31 = arith.maximumf %29, %30 : vector<32x128xf32>
    %cst_19 = arith.constant dense<0.000000e+00> : vector<1x128xf32>
    %32 = tpu.matmul %25, %31, %cst_19 {dimension_numbers = #tpu.dot_dimension_numbers<[1], [0], [0], [1], [0, 0, 1, 1], [], []>} : vector<1x32xf32>, vector<32x128xf32>, vector<1x128xf32> -> vector<1x128xf32>
    %33 = vector.broadcast %24 : f32 to vector<1x128xf32>
    %34 = arith.addf %32, %33 : vector<1x128xf32>
    %35 = vector.extract_strided_slice %26 {offsets = [0, 1], sizes = [32, 1], strides = [1, 1]} : vector<32x5xf32> to vector<32x1xf32>
    %36 = vector.broadcast %35 : vector<32x1xf32> to vector<32x128xf32>
    %37 = arith.addf %3, %36 : vector<32x128xf32>
    %cst_20 = arith.constant 0.000000e+00 : f32
    %38 = vector.broadcast %cst_20 : f32 to vector<32x128xf32>
    %39 = arith.maximumf %37, %38 : vector<32x128xf32>
    %cst_21 = arith.constant dense<0.000000e+00> : vector<1x128xf32>
    %40 = tpu.matmul %25, %39, %cst_21 {dimension_numbers = #tpu.dot_dimension_numbers<[1], [0], [0], [1], [0, 0, 1, 1], [], []>} : vector<1x32xf32>, vector<32x128xf32>, vector<1x128xf32> -> vector<1x128xf32>
    %41 = vector.broadcast %24 : f32 to vector<1x128xf32>
    %42 = arith.addf %40, %41 : vector<1x128xf32>
    %43 = vector.extract_strided_slice %26 {offsets = [0, 2], sizes = [32, 1], strides = [1, 1]} : vector<32x5xf32> to vector<32x1xf32>
    %44 = vector.broadcast %43 : vector<32x1xf32> to vector<32x128xf32>
    %45 = arith.addf %3, %44 : vector<32x128xf32>
    %cst_22 = arith.constant 0.000000e+00 : f32
    %46 = vector.broadcast %cst_22 : f32 to vector<32x128xf32>
    %47 = arith.maximumf %45, %46 : vector<32x128xf32>
    %cst_23 = arith.constant dense<0.000000e+00> : vector<1x128xf32>
    %48 = tpu.matmul %25, %47, %cst_23 {dimension_numbers = #tpu.dot_dimension_numbers<[1], [0], [0], [1], [0, 0, 1, 1], [], []>} : vector<1x32xf32>, vector<32x128xf32>, vector<1x128xf32> -> vector<1x128xf32>
    %49 = vector.broadcast %24 : f32 to vector<1x128xf32>
    %50 = arith.addf %48, %49 : vector<1x128xf32>
    %51 = vector.extract_strided_slice %26 {offsets = [0, 3], sizes = [32, 1], strides = [1, 1]} : vector<32x5xf32> to vector<32x1xf32>
    %52 = vector.broadcast %51 : vector<32x1xf32> to vector<32x128xf32>
    %53 = arith.addf %3, %52 : vector<32x128xf32>
    %cst_24 = arith.constant 0.000000e+00 : f32
    %54 = vector.broadcast %cst_24 : f32 to vector<32x128xf32>
    %55 = arith.maximumf %53, %54 : vector<32x128xf32>
    %cst_25 = arith.constant dense<0.000000e+00> : vector<1x128xf32>
    %56 = tpu.matmul %25, %55, %cst_25 {dimension_numbers = #tpu.dot_dimension_numbers<[1], [0], [0], [1], [0, 0, 1, 1], [], []>} : vector<1x32xf32>, vector<32x128xf32>, vector<1x128xf32> -> vector<1x128xf32>
    %57 = vector.broadcast %24 : f32 to vector<1x128xf32>
    %58 = arith.addf %56, %57 : vector<1x128xf32>
    %59 = vector.extract_strided_slice %26 {offsets = [0, 4], sizes = [32, 1], strides = [1, 1]} : vector<32x5xf32> to vector<32x1xf32>
    %60 = vector.broadcast %59 : vector<32x1xf32> to vector<32x128xf32>
    %61 = arith.addf %3, %60 : vector<32x128xf32>
    %cst_26 = arith.constant 0.000000e+00 : f32
    %62 = vector.broadcast %cst_26 : f32 to vector<32x128xf32>
    %63 = arith.maximumf %61, %62 : vector<32x128xf32>
    %cst_27 = arith.constant dense<0.000000e+00> : vector<1x128xf32>
    %64 = tpu.matmul %25, %63, %cst_27 {dimension_numbers = #tpu.dot_dimension_numbers<[1], [0], [0], [1], [0, 0, 1, 1], [], []>} : vector<1x32xf32>, vector<32x128xf32>, vector<1x128xf32> -> vector<1x128xf32>
    %65 = vector.broadcast %24 : f32 to vector<1x128xf32>
    %66 = arith.addf %64, %65 : vector<1x128xf32>
    %67 = tpu.concatenate %34, %42, %50, %58, %66 in 0 : vector<1x128xf32>, vector<1x128xf32>, vector<1x128xf32>, vector<1x128xf32>, vector<1x128xf32> -> vector<5x128xf32>
    %68 = arith.mulf %67, %23 : vector<5x128xf32>
    %c0_28 = arith.constant 0 : index
    %c0_29 = arith.constant 0 : index
    %69 = vector.load %arg9[%c0_28, %c0_29] : memref<5x128xf32, #tpu.memory_space<vmem>>, vector<5x128xf32>
    tpu.vector_store %arg9[%c0_28, %c0_29], %68 {strides = array<i32>} : memref<5x128xf32, #tpu.memory_space<vmem>>, vector<5x128xf32>,
    %c0_30 = arith.constant 0 : index
    %c0_31 = arith.constant 0 : index
    %70 = vector.load %arg10[%c0_30, %c0_31] : memref<5x128xf32, #tpu.memory_space<vmem>>, vector<5x128xf32>
    tpu.vector_store %arg10[%c0_30, %c0_31], %23 {strides = array<i32>} : memref<5x128xf32, #tpu.memory_space<vmem>>, vector<5x128xf32>,
    return
  }
  func.func @transform_0(%arg0: i32) -> (i32, i32) {
    %c0_i32 = arith.constant 0 : i32
    %c0_i32_0 = arith.constant 0 : i32
    return %arg0, %c0_i32 : i32, i32
  }
  func.func @transform_1(%arg0: i32) -> (i32, i32) {
    %c0_i32 = arith.constant 0 : i32
    %c0_i32_0 = arith.constant 0 : i32
    %c0_i32_1 = arith.constant 0 : i32
    return %c0_i32, %c0_i32_0 : i32, i32
  }
  func.func @transform_2(%arg0: i32) -> (i32, i32) {
    %c0_i32 = arith.constant 0 : i32
    %c0_i32_0 = arith.constant 0 : i32
    %c0_i32_1 = arith.constant 0 : i32
    return %c0_i32, %c0_i32_0 : i32, i32
  }
  func.func @transform_3(%arg0: i32) -> (i32, i32) {
    %c0_i32 = arith.constant 0 : i32
    %c0_i32_0 = arith.constant 0 : i32
    %c0_i32_1 = arith.constant 0 : i32
    return %c0_i32, %c0_i32_0 : i32, i32
  }
  func.func @transform_4(%arg0: i32) -> (i32, i32) {
    %c0_i32 = arith.constant 0 : i32
    %c0_i32_0 = arith.constant 0 : i32
    %c0_i32_1 = arith.constant 0 : i32
    return %c0_i32, %c0_i32_0 : i32, i32
  }
  func.func @transform_5(%arg0: i32) -> (i32, i32) {
    %c0_i32 = arith.constant 0 : i32
    %c0_i32_0 = arith.constant 0 : i32
    %c0_i32_1 = arith.constant 0 : i32
    return %c0_i32, %c0_i32_0 : i32, i32
  }
  func.func @transform_6(%arg0: i32) -> (i32, i32) {
    %c0_i32 = arith.constant 0 : i32
    %c0_i32_0 = arith.constant 0 : i32
    %c0_i32_1 = arith.constant 0 : i32
    return %c0_i32, %c0_i32_0 : i32, i32
  }
  func.func @transform_7(%arg0: i32) -> (i32, i32) {
    %c0_i32 = arith.constant 0 : i32
    %c0_i32_0 = arith.constant 0 : i32
    %c0_i32_1 = arith.constant 0 : i32
    return %c0_i32, %c0_i32_0 : i32, i32
  }
  func.func @transform_8(%arg0: i32) -> (i32, i32) {
    %c0_i32 = arith.constant 0 : i32
    %c0_i32_0 = arith.constant 0 : i32
    return %c0_i32, %arg0 : i32, i32
  }
  func.func @transform_9(%arg0: i32) -> (i32, i32) {
    %c0_i32 = arith.constant 0 : i32
    %c0_i32_0 = arith.constant 0 : i32
    return %c0_i32, %arg0 : i32, i32
  }
}

</mosaic_0001>

<bundles_post_ra>
// kernel: time_attention_forward.1
= control target key start
LH: loop header
LB: loop body
LE: loop exit
PB: predicated region body
PF: predicated region fallthrough
CT: control target
= control target key end

     0   :  { %vm56_vm0 = vcmask 64512   ;;  %v1192_v3 = vmov 0   ;;  %v1193_v26 = vmov 1   ;;  %v1194_v30 = vmov 2   ;;  %s1454_s0 = inlined_call_operand.vmem [shape: f32[128,8], index: 0, kind: input, shape index: {}]   ;;  %s1455_s1 = inlined_call_operand.vmem [shape: f32[64,8], index: 1, kind: input, shape index: {}]   ;;  %s1456_s2 = inlined_call_operand.vmem [shape: f32[32,1], index: 2, kind: input, shape index: {}]   ;;  %s1457_s6 = inlined_call_operand.vmem [shape: f32[32,5], index: 6, kind: input, shape index: {}]   ;;  %s1458_s4 = inlined_call_operand.vmem [shape: f32[5,1], index: 4, kind: input, shape index: {}]   ;;  %s1459_s3 = inlined_call_operand.vmem [shape: f32[5,32], index: 3, kind: input, shape index: {}]   ;;  %s1460_s5 = inlined_call_operand.vmem [shape: f32[1,32], index: 5, kind: input, shape index: {}]   ;;  %s1461_s7 = inlined_call_operand.<no memory space> [shape: f32[1,1], index: 7, kind: input, shape index: {}]   ;;  %s1462_s9 = inlined_call_operand.vmem [shape: f32[5,128], index: 9, kind: output, shape index: {1}]   ;;  %s1463_s8 = inlined_call_operand.vmem [shape: f32[5,128], index: 8, kind: output, shape index: {0}]  }
   0x1   :  { %v40_v0 = vld [vmem:[%s1454_s0] sm:$0xff]  ;;  %v41_v1 = vld [vmem:[%s1454_s0 + $0x8] sm:$0xff]  ;;  %vm1258_vm1 = vmpackc.low %vm56_vm0, %vm56_vm0  ;;  %1169 = vset.pattern.permute.xlu1 %v1192_v3  ;;  %1168 = vset.pattern.permute.xlu0 %v1192_v3  ;;  %v1195_v33 = vmov 3   ;;  %v1196_v38 = vmov 4   ;;  %v1197_v46 = vmov 0.0|0.0   ;;  %vm1198_vm2 = vmmov 0  }
   0x2   :  { %v1076_v4 = vpack.c.bf16 %v41_v1, %v40_v0  ;;  %v42_v5 = vld [vmem:[%s1454_s0 + $0x10] sm:$0xff]  ;;  %v43_v6 = vld [vmem:[%s1454_s0 + $0x18] sm:$0xff]  ;;  %v32_v8 = vld [vmem:[%s1455_s1] sm:$0xff]  ;;  %1124 = vmatprep.subr.bf16.mxu1 %v1197_v46  ;;  %v1199_v47 = vmov 0.0   ;;  %vm273_vm3 = vcmask 261120   ;;  %vm347_vm4 = vcmask 1044480  }
   0x3   :  { %v1082_v7 = vpack.c.bf16 %v43_v6, %v42_v5  ;;  %v44_v9 = vld [vmem:[%s1454_s0 + $0x20] sm:$0xff]  ;;  %v45_v10 = vld [vmem:[%s1454_s0 + $0x28] sm:$0xff]  ;;  %998 = vmatprep.mubr.msk.f32.mxu0 %vm56_vm0, %v32_v8  ;;  %v236_v11 = vld [vmem:[%s1456_s2 + $0x10] sm:$0xff]  ;;  %1018 = vmatprep.mubr.msk.f32.mxu1 %vm1198_vm2, %v1199_v47  ;;  %vm863_vm5 = vcmask 1040384   ;;  %vm865_vm6 = vcmask 1041408   ;;  %vm867_vm7 = vcmask 1042432  }
   0x4   :  { %1078 = vmatprep.subr.msk.bf16.mxu0 %vm1258_vm1, %v1076_v4  ;;  %v1088_v12 = vpack.c.bf16 %v45_v10, %v44_v9  ;;  %250 = vperm.xlu1 %1169, %v236_v11   ;;  %v234_v13 = vld [vmem:[%s1456_s2] sm:$0xff]  ;;  %v237_v14 = vld [vmem:[%s1456_s2 + $0x18] sm:$0xff]  ;;  %v235_v15 = vld [vmem:[%s1456_s2 + $0x8] sm:$0xff]  ;;  %vm869_vm8 = vcmask 1043456  }
   0x5   :  { %1081 = vmatpush3.bf16.xpose.msk.msra.mxu0 %vm1258_vm1, %v1076_v4  ;;  %240 = vperm.xlu0 %1168, %v234_v13   ;;  %v46_v16 = vld [vmem:[%s1454_s0 + $0x30] sm:$0xff]  ;;  %v47_v17 = vld [vmem:[%s1454_s0 + $0x38] sm:$0xff]  ;;  %v370_v18 = vld [vmem:[%s1457_s6 + $0x8] sm:$0xff] }
   0x6   :  { %1084 = vmatprep.subr.msk.bf16.mxu0 %vm1258_vm1, %v1082_v7  ;;  %v369_v19 = vld [vmem:[%s1457_s6] sm:$0xff]  ;;  %v1094_v20 = vpack.c.bf16 %v47_v17, %v46_v16  ;;  %v372_v21 = vld [vmem:[%s1457_s6 + $0x18] sm:$0xff]  ;;  %v371_v22 = vld [vmem:[%s1457_s6 + $0x10] sm:$0xff] }
   0x7   :  { %v48_v23 = vld [vmem:[%s1454_s0 + $0x40] sm:$0xff]  ;;  %v49_v24 = vld [vmem:[%s1454_s0 + $0x48] sm:$0xff]  ;;  %v50_v27 = vld [vmem:[%s1454_s0 + $0x50] sm:$0xff] }
   0x8   :  { %255 = vperm.xlu1 %1169, %v237_v14   ;;  %v1100_v25 = vpack.c.bf16 %v49_v24, %v48_v23  ;;  %v51_v28 = vld [vmem:[%s1454_s0 + $0x58] sm:$0xff]  ;;  %v52_v31 = vld [vmem:[%s1454_s0 + $0x60] sm:$0xff]  ;;  %v53_v32 = vld [vmem:[%s1454_s0 + $0x68] sm:$0xff] }
   0x9   :  { %245 = vperm.xlu0 %1168, %v235_v15   ;;  %v1106_v29 = vpack.c.bf16 %v51_v28, %v50_v27  ;;  %v1112_v34 = vpack.c.bf16 %v53_v32, %v52_v31  ;;  %v54_v35 = vld [vmem:[%s1454_s0 + $0x70] sm:$0xff]  ;;  %v55_v36 = vld [vmem:[%s1454_s0 + $0x78] sm:$0xff]  ;;  %v33_v39 = vld [vmem:[%s1455_s1 + $0x8] sm:$0xff] }
   0xa   :  { %v1118_v37 = vpack.c.bf16 %v55_v36, %v54_v35  ;;  %v34_v40 = vld [vmem:[%s1455_s1 + $0x10] sm:$0xff]  ;;  %v35_v41 = vld [vmem:[%s1455_s1 + $0x18] sm:$0xff]  ;;  %v36_v42 = vld [vmem:[%s1455_s1 + $0x20] sm:$0xff] }
   0xb   :  { %v37_v43 = vld [vmem:[%s1455_s1 + $0x28] sm:$0xff]  ;;  %v38_v44 = vld [vmem:[%s1455_s1 + $0x30] sm:$0xff]  ;;  %v39_v45 = vld [vmem:[%s1455_s1 + $0x38] sm:$0xff] }
   0xc   :  { %380 = vperm.xlu1 %1169, %v370_v18   ;;  %v267_v53 = vld [vmem:[%s1458_s4] sm:$0x1f] }
   0xd   :  { %1087 = vmatpush3.bf16.xpose.msk.msra.mxu0 %vm1258_vm1, %v1082_v7  ;;  %375 = vperm.xlu0 %1168, %v369_v19  }
   0xe   :  { %1090 = vmatprep.subr.msk.bf16.mxu0 %vm1258_vm1, %v1088_v12 }
  0x10   :  { %390 = vperm.xlu1 %1169, %v372_v21  }
  0x11   :  { %385 = vperm.xlu0 %1168, %v371_v22  }
  0x14   :  { %1171 = vset.pattern.permute.xlu1 %v1193_v26 }
  0x15   :  { %1093 = vmatpush3.bf16.xpose.msk.msra.mxu0 %vm1258_vm1, %v1088_v12  ;;  %480 = vperm.xlu1 %1171, %v370_v18  }
  0x16   :  { %1096 = vmatprep.subr.msk.bf16.mxu0 %vm1258_vm1, %v1094_v20  ;;  %1170 = vset.pattern.permute.xlu0 %v1193_v26 }
  0x17   :  { %476 = vperm.xlu0 %1170, %v369_v19  }
  0x19   :  { %484 = vperm.xlu1 %1171, %v371_v22  }
  0x1b   :  { %488 = vperm.xlu0 %1170, %v372_v21  }
  0x1d   :  { %1099 = vmatpush3.bf16.xpose.msk.msra.mxu0 %vm1258_vm1, %v1094_v20  ;;  %1172 = vset.pattern.permute.xlu1 %v1194_v30 }
  0x1e   :  { %1102 = vmatprep.subr.msk.bf16.mxu0 %vm1258_vm1, %v1100_v25  ;;  %570 = vperm.xlu1 %1172, %v369_v19  }
  0x1f   :  { %1173 = vset.pattern.permute.xlu0 %v1194_v30 }
  0x20   :  { %574 = vperm.xlu0 %1173, %v370_v18  }
  0x22   :  { %578 = vperm.xlu1 %1172, %v371_v22  }
  0x24   :  { %1174 = vset.pattern.permute.xlu0 %v1195_v33 }
  0x25   :  { %1105 = vmatpush3.bf16.xpose.msk.msra.mxu0 %vm1258_vm1, %v1100_v25  ;;  %664 = vperm.xlu0 %1174, %v369_v19  }
  0x26   :  { %1108 = vmatprep.subr.msk.bf16.mxu0 %vm1258_vm1, %v1106_v29  ;;  %582 = vperm.xlu1 %1172, %v372_v21  }
  0x29   :  { %676 = vperm.xlu0 %1174, %v372_v21  }
  0x2a   :  { %1175 = vset.pattern.permute.xlu1 %v1195_v33 }
  0x2b   :  { %668 = vperm.xlu1 %1175, %v370_v18  }
  0x2d   :  { %1111 = vmatpush3.bf16.xpose.msk.msra.mxu0 %vm1258_vm1, %v1106_v29  ;;  %1177 = vset.pattern.permute.xlu0 %v1196_v38 }
  0x2e   :  { %1114 = vmatprep.subr.msk.bf16.mxu0 %vm1258_vm1, %v1112_v34  ;;  %762 = vperm.xlu0 %1177, %v370_v18  }
  0x2f   :  { %672 = vperm.xlu1 %1175, %v371_v22  }
  0x32   :  { %1178 = vset.pattern.permute.xlu0 %v1192_v3 }
  0x33   :  { %1176 = vset.pattern.permute.xlu1 %v1196_v38  ;;  %270 = vperm.xlu0 %1178, %v267_v53  }
  0x34   :  { %758 = vperm.xlu1 %1176, %v369_v19  }
  0x35   :  { %1117 = vmatpush3.bf16.xpose.msk.msra.mxu0 %vm1258_vm1, %v1112_v34 }
  0x36   :  { %1120 = vmatprep.subr.msk.bf16.mxu0 %vm1258_vm1, %v1118_v37 }
  0x37   :  { %1179 = vset.pattern.permute.xlu0 %v1196_v38 }
  0x38   :  { %766 = vperm.xlu1 %1176, %v371_v22  }
  0x3c   :  { %770 = vperm.xlu1 %1176, %v372_v21  }
  0x3d   :  { %1123 = vmatpush3.bf16.xpose.msk.msra.mxu0 %vm1258_vm1, %v1118_v37 }
  0x44   :  { %999 = vmatmul.mubr.msk.f32.vlgmr.msra.gmra.mrb[0].mxu0 %vm56_vm0, %v33_v39 }
  0x45   :  { %1001 = vmatprep.mubr.msk.f32.mxu0 %vm56_vm0, %v34_v40 }
  0x48   :  { %1002 = vmatmul.mubr.msk.f32.gmra.mrb[2].mxu0 %vm56_vm0, %v35_v41 }
  0x49   :  { %1004 = vmatprep.mubr.msk.f32.mxu0 %vm56_vm0, %v36_v42 }
  0x4c   :  { %1005 = vmatmul.mubr.msk.f32.gmra.mrb[4].mxu0 %vm56_vm0, %v37_v43 }
  0x4d   :  { %1007 = vmatprep.mubr.msk.f32.mxu0 %vm56_vm0, %v38_v44 }
  0x50   :  { %1008 = vmatmul.mubr.msk.f32.gmra.mrb[6].mxu0 %vm56_vm0, %v39_v45 }
  0x83   :  { %v1398_v48 = vpop.permute.xlu1 %250 }
  0x84   :  { %v1402_v52 = vpop.permute.xlu0 %240 }
  0x87   :  { %v1400_v49 = vpop.permute.xlu1 %255 }
  0x88   :  { %v246_v55 = vpop.permute.xlu0 %245 }
  0x8b   :  { %v381_v50 = vpop.permute.xlu1 %380 }
  0x8c   :  { %v376_v57 = vpop.permute.xlu0 %375 }
  0x8f   :  { %v391_v51 = vpop.permute.xlu1 %390 }
  0x90   :  { %v386_v59 = vpop.permute.xlu0 %385 }
  0x94   :  { %v481_v54 = vpop.permute.xlu1 %480 }
  0x96   :  { %v477_v61 = vpop.permute.xlu0 %476 }
  0x98   :  { %v485_v56 = vpop.permute.xlu1 %484 }
  0x9a   :  { %v489_v63 = vpop.permute.xlu0 %488 }
  0x9d   :  { %v571_v58 = vpop.permute.xlu1 %570 }
  0x9f   :  { %v575_v1 = vpop.permute.xlu0 %574 }
  0xa1   :  { %v579_v60 = vpop.permute.xlu1 %578 }
  0xa4   :  { %v665_v3 = vpop.permute.xlu0 %664 }
  0xa5   :  { %v583_v62 = vpop.permute.xlu1 %582 }
  0xa8   :  { %v677_v5 = vpop.permute.xlu0 %676 }
  0xaa   :  { %v669_v0 = vpop.permute.xlu1 %668 }
  0xad   :  { %v763_v7 = vpop.permute.xlu0 %762 }
  0xae   :  { %v673_v2 = vpop.permute.xlu1 %672 }
  0xb3   :  { %v759_v4 = vpop.permute.xlu1 %758 }
  0xb7   :  { %v767_v6 = vpop.permute.xlu1 %766 }
  0xbb   :  { %v771_v22 = vpop.permute.xlu1 %770 }
 0x117   :  { %v1000_v8 = vpop.f32.mrb[0].mxu0 }
 0x118   :  { %v394_v9 = vadd.f32 %v1000_v8, %v381_v50  ;;  %v492_v10 = vadd.f32 %v1000_v8, %v481_v54  ;;  %v586_v11 = vadd.f32 %v1000_v8, %v575_v1  ;;  %v680_v12 = vadd.f32 %v1000_v8, %v669_v0  ;;  %v195_v13 = vpop.f32.mrb[1].mxu0 }
 0x119   :  { %v774_v14 = vadd.f32 %v1000_v8, %v763_v7  ;;  %v393_v15 = vadd.f32 %v376_v57, %v195_v13  ;;  %v491_v16 = vadd.f32 %v477_v61, %v195_v13  ;;  %v585_v17 = vadd.f32 %v571_v58, %v195_v13 }
 0x11a   :  { %v398_v18 = vmax.f32 %v394_v9, 0.0  ;;  %v496_v19 = vmax.f32 %v492_v10, 0.0  ;;  %v590_v20 = vmax.f32 %v586_v11, 0.0  ;;  %v684_v21 = vmax.f32 %v680_v12, 0.0 }
 0x11b   :  { %v778_v23 = vmax.f32 %v774_v14, 0.0  ;;  %v397_v24 = vmax.f32 %v393_v15, 0.0  ;;  %v495_v25 = vmax.f32 %v491_v16, 0.0  ;;  %v589_v26 = vmax.f32 %v585_v17, 0.0  ;;  %v1003_v27 = vpop.f32.mrb[2].mxu0  ;;  %v271_v17 = vpop.permute.xlu0 %270 }
 0x11c   :  { %v679_v28 = vadd.f32 %v665_v3, %v195_v13  ;;  %v773_v29 = vadd.f32 %v759_v4, %v195_v13  ;;  %v396_v30 = vadd.f32 %v1003_v27, %v391_v51  ;;  %v494_v31 = vadd.f32 %v1003_v27, %v489_v63  ;;  %v205_v32 = vpop.f32.mrb[3].mxu0 }
 0x11d   :  { %v588_v33 = vadd.f32 %v1003_v27, %v583_v62  ;;  %v682_v34 = vadd.f32 %v1003_v27, %v677_v5  ;;  %v776_v35 = vadd.f32 %v1003_v27, %v771_v22  ;;  %v395_v36 = vadd.f32 %v386_v59, %v205_v32 }
 0x11e   :  { %v683_v37 = vmax.f32 %v679_v28, 0.0  ;;  %v777_v38 = vmax.f32 %v773_v29, 0.0  ;;  %v400_v39 = vmax.f32 %v396_v30, 0.0  ;;  %v498_v40 = vmax.f32 %v494_v31, 0.0 }
 0x11f   :  { %v592_v41 = vmax.f32 %v588_v33, 0.0  ;;  %v686_v42 = vmax.f32 %v682_v34, 0.0  ;;  %v780_v43 = vmax.f32 %v776_v35, 0.0  ;;  %v399_v44 = vmax.f32 %v395_v36, 0.0  ;;  %v1006_v45 = vpop.f32.mrb[4].mxu0 }
 0x120   :  { %v493_v50 = vadd.f32 %v485_v56, %v205_v32  ;;  %v587_v53 = vadd.f32 %v579_v60, %v205_v32  ;;  %v681_v54 = vadd.f32 %v673_v2, %v205_v32  ;;  %v775_v57 = vadd.f32 %v767_v6, %v205_v32  ;;  %v215_v51 = vpop.f32.mrb[5].mxu0 }
 0x121   :  { %v259_v58 = vadd.f32 %v1006_v45, %v246_v55  ;;  %v258_v61 = vadd.f32 %v1402_v52, %v215_v51  ;;  %v1131_v62 = vpack.c.bf16 %v398_v18, %v397_v24  ;;  %v1134_v63 = vpack.c.bf16 %v400_v39, %v399_v44 }
 0x122   :  { %v497_v59 = vmax.f32 %v493_v50, 0.0  ;;  %v591_v0 = vmax.f32 %v587_v53, 0.0  ;;  %v685_v1 = vmax.f32 %v681_v54, 0.0  ;;  %v779_v3 = vmax.f32 %v775_v57, 0.0 }
 0x123   :  { %1180 = vtanh.f32 %v259_v58  ;;  %v1009_v4 = vpop.f32.mrb[6].mxu0  ;;  %v1137_v5 = vpack.c.bf16 %v496_v19, %v495_v25  ;;  %v1143_v7 = vpack.c.bf16 %v590_v20, %v589_v26  ;;  %v1149_v8 = vpack.c.bf16 %v684_v21, %v683_v37 }
 0x124   :  { %1182 = vtanh.f32 %v258_v61  ;;  %v261_v56 = vadd.f32 %v1009_v4, %v1400_v49  ;;  %v225_v60 = vpop.f32.mrb[7].mxu0  ;;  %v1140_v2 = vpack.c.bf16 %v498_v40, %v497_v59  ;;  %v1146_v6 = vpack.c.bf16 %v592_v41, %v591_v0  ;;  %v266_v49 = vld [vmem:[%s1459_s3] sm:$0x1f] }
 0x125   :  { %v260_v55 = vadd.f32 %v1398_v48, %v225_v60  ;;  %v1152_v52 = vpack.c.bf16 %v686_v42, %v685_v1  ;;  %v1155_v9 = vpack.c.bf16 %v778_v23, %v777_v38  ;;  %v1158_v10 = vpack.c.bf16 %v780_v43, %v779_v3  ;;  %v368_v48 = vld [vmem:[%s1460_s5] sm:$0x1] }
 0x126   :  { %1184 = vtanh.f32 %v261_v56 }
 0x127   :  { %1186 = vtanh.f32 %v260_v55 }
 0x12d   :  { %v1181_v11 = vpop.eup %1180 }
 0x12e   :  { %v1183_v12 = vpop.eup %1182 }
 0x12f   :  { %v1125_v13 = vpack.c.bf16 %v1181_v11, %v1183_v12 }
 0x130   :  { %v1185_v14 = vpop.eup %1184 }
 0x131   :  { %v1187_v15 = vpop.eup %1186  ;;  %1126 = vmatpush3.bf16.msra.mxu1 %v1125_v13 }
 0x132   :  { %1127 = vmatprep.subr.bf16.mxu1 %v1197_v46  ;;  %v1128_v16 = vpack.c.bf16 %v1185_v14, %v1187_v15 }
 0x135   :  { %1129 = vmatpush3.bf16.msra.mxu1 %v1128_v16 }
 0x136   :  { %1130 = vmatprep.subr.bf16.mxu1 %v1197_v46 }
 0x138   :  { %1019 = vmatmul.mubr.msk.f32.vlgmr.msra.gmra.mrb[0].mxu1 %vm273_vm3, %v266_v49 }
 0x139   :  { %1132 = vmatpush3.bf16.msra.mxu1 %v1131_v62  ;;  %1029 = vmatprep.mubr.msk.f32.mxu1 %vm1198_vm2, %v1199_v47 }
 0x13a   :  { %1133 = vmatprep.subr.bf16.mxu1 %v1197_v46 }
 0x13d   :  { %1135 = vmatpush3.bf16.msra.mxu1 %v1134_v63 }
 0x13e   :  { %1136 = vmatprep.subr.bf16.mxu1 %v1197_v46 }
 0x140   :  { %1030 = vmatmul.mubr.msk.f32.vlgmr.msra.gmra.mrb[2].mxu1 %vm273_vm3, %v368_v48 }
 0x141   :  { %1138 = vmatpush3.bf16.msra.mxu1 %v1137_v5  ;;  %1040 = vmatprep.mubr.msk.f32.mxu1 %vm1198_vm2, %v1199_v47 }
 0x142   :  { %1139 = vmatprep.subr.bf16.mxu1 %v1197_v46 }
 0x145   :  { %1141 = vmatpush3.bf16.msra.mxu1 %v1140_v2 }
 0x146   :  { %1142 = vmatprep.subr.bf16.mxu1 %v1197_v46 }
 0x148   :  { %1041 = vmatmul.mubr.msk.f32.vlgmr.msra.gmra.mrb[4].mxu1 %vm273_vm3, %v368_v48 }
 0x149   :  { %1144 = vmatpush3.bf16.msra.mxu1 %v1143_v7  ;;  %1051 = vmatprep.mubr.msk.f32.mxu1 %vm1198_vm2, %v1199_v47 }
 0x14a   :  { %1145 = vmatprep.subr.bf16.mxu1 %v1197_v46 }
 0x14d   :  { %1147 = vmatpush3.bf16.msra.mxu1 %v1146_v6 }
 0x14e   :  { %1148 = vmatprep.subr.bf16.mxu1 %v1197_v46 }
 0x150   :  { %1052 = vmatmul.mubr.msk.f32.vlgmr.msra.gmra.mrb[6].mxu1 %vm273_vm3, %v368_v48 }
 0x151   :  { %1150 = vmatpush3.bf16.msra.mxu1 %v1149_v8  ;;  %1062 = vmatprep.mubr.msk.f32.mxu1 %vm1198_vm2, %v1199_v47 }
 0x152   :  { %1151 = vmatprep.subr.bf16.mxu1 %v1197_v46 }
 0x155   :  { %1153 = vmatpush3.bf16.msra.mxu1 %v1152_v52 }
 0x156   :  { %1154 = vmatprep.subr.bf16.mxu1 %v1197_v46 }
 0x158   :  { %1063 = vmatmul.mubr.msk.f32.vlgmr.msra.gmra.mrb[8].mxu1 %vm273_vm3, %v368_v48 }
 0x159   :  { %1156 = vmatpush3.bf16.msra.mxu1 %v1155_v9  ;;  %1073 = vmatprep.mubr.msk.f32.mxu1 %vm1198_vm2, %v1199_v47 }
 0x15a   :  { %1157 = vmatprep.subr.bf16.mxu1 %v1197_v46  ;;  %v401_v46 = vstv %s1461_s7 }
 0x15d   :  { %1159 = vmatpush3.bf16.msra.mxu1 %v1158_v10 }
 0x160   :  { %1074 = vmatmul.mubr.msk.f32.vlgmr.msra.gmra.mrb[10].mxu1 %vm273_vm3, %v368_v48 }
 0x20b   :  { %v343_v18 = vpop.f32.mrb[0].mxu1 }
 0x20c   :  { %v344_v19 = vadd.f32 %v343_v18, %v271_v17  ;;  %v1020_v20 = vpop.f32.mrb[1].mxu1 }
 0x20e   :  { %v348_v21 = vsel %vm347_vm4, %v344_v19, -inf }
 0x20f   :  { %v349_v22 = vrot.slane %v348_v21, 4 }
 0x211   :  { %v350_v23 = vmax.f32 %v348_v21, %v349_v22 }
 0x213   :  { %v351_v24 = vrot.slane %v350_v23, 2  ;;  %v471_v25 = vpop.f32.mrb[2].mxu1 }
 0x214   :  { %v1031_v26 = vpop.f32.mrb[3].mxu1  ;;  %v472_v31 = vadd.f32 %v471_v25, %v401_v46 }
 0x215   :  { %v352_v27 = vmax.f32 %v350_v23, %v351_v24 }
 0x217   :  { %v353_v28 = vrot.slane %v352_v27, 1 }
 0x219   :  { %v354_v47 = vmax.f32 %v352_v27, %v353_v28 }
 0x21b   :  { %v355_v29 = vsub.f32 %v344_v19, %v354_v47  ;;  %v565_v30 = vpop.f32.mrb[4].mxu1 }
 0x21c   :  { %v566_v32 = vadd.f32 %v565_v30, %v401_v46  ;;  %v1042_v33 = vpop.f32.mrb[5].mxu1 }
 0x21d   :  { %v356_v34 = vmul.f32 1.442695, %v355_v29 }
 0x21e   :  { %v852_v35 = vrot.slane %v566_v32, 7 }
 0x21f   :  { %1188 = vpow2.f32 %v356_v34 }
 0x220   :  { %v864_v36 = vsel %vm863_vm5, %v472_v31, %v852_v35 }
 0x223   :  { %v659_v37 = vpop.f32.mrb[6].mxu1 }
 0x224   :  { %v660_v38 = vadd.f32 %v659_v37, %v401_v46  ;;  %v1053_v39 = vpop.f32.mrb[7].mxu1 }
 0x226   :  { %v855_v40 = vrot.slane %v660_v38, 6 }
 0x228   :  { %v866_v41 = vsel %vm865_vm6, %v864_v36, %v855_v40 }
 0x229   :  { %v1189_v42 = vpop.eup %1188 }
 0x22a   :  { %v358_v43 = vsel %vm347_vm4, %v1189_v42, 0.0 }
 0x22b   :  { %v359_v44 = vrot.slane %v358_v43, 4  ;;  %v753_v45 = vpop.f32.mrb[8].mxu1 }
 0x22c   :  { %v754_v50 = vadd.f32 %v753_v45, %v401_v46  ;;  %v1064_v53 = vpop.f32.mrb[9].mxu1 }
 0x22d   :  { %v360_v54 = vadd.f32 %v359_v44, %v358_v43 }
 0x22e   :  { %v858_v57 = vrot.slane %v754_v50, 5 }
 0x22f   :  { %v361_v51 = vrot.slane %v360_v54, 2 }
 0x230   :  { %v868_v58 = vsel %vm867_vm7, %v866_v41, %v858_v57 }
 0x231   :  { %v362_v61 = vadd.f32 %v361_v51, %v360_v54 }
 0x233   :  { %v363_v62 = vrot.slane %v362_v61, 1  ;;  %v847_v63 = vpop.f32.mrb[10].mxu1 }
 0x234   :  { %v848_v59 = vadd.f32 %v847_v63, %v401_v46  ;;  %v1075_v0 = vpop.f32.mrb[11].mxu1 }
 0x235   :  { %v364_v1 = vadd.f32 %v363_v62, %v362_v61 }
 0x236   :  { %v861_v3 = vrot.slane %v848_v59, 4 }
 0x237   :  { %1190 = vrcp.f32 %v364_v1 }
 0x238   :  { %v870_v4 = vsel %vm869_vm8, %v868_v58, %v861_v3 }
 0x241   :  { %v1191_v5 = vpop.eup %1190 }
 0x242   :  { %v366_v7 = vmul.f32 %v1191_v5, %v1189_v42 }
 0x244   :  { %v871_v8 = vmul.f32 %v870_v4, %v366_v7  ;;  %873 = vst [vmem:[%s1462_s9] sm:$0x1f] %v366_v7 }
 0x246   :  { %872 = vst [vmem:[%s1463_s8] sm:$0x1f] %v871_v8 }

</bundles_post_ra>
